<compile_context>
chip_gen: v6e
topology: v6e:2x2x1
jax: 0.10.0
libtpu: 0.0.40
codegen_flags: <defaults>
</compile_context>

<pallas_src>
import jax
import jax.numpy as jnp
from jax.experimental import pallas as pl
from jax.experimental.pallas import tpu as pltpu


def _round_up(x: int, m: int) -> int:
    return ((x + m - 1) // m) * m


def _choose_tile_b(batch: int, tile_b_cap: int) -> int:
    """Lane-aligned batch tile.

    batch <= 128  -> one 128-wide tile (minimum lane-dense output width).
    batch  > 128  -> aim for >= 4 grid steps (double-buffered pipeline + both
                     v7x TensorCores), tiles a multiple of 256 when large
                     (matches the 256-wide MXU result tiles on v6e/v7x).
    """
    cap = max(128, _round_up(tile_b_cap, 128))
    if batch <= 128:
        return 128
    quarter = -(-batch // 4)
    align = 256 if quarter > 128 else 128
    tile = _round_up(quarter, align)
    return max(128, min(tile, cap))


def _make_mlp_kernel(num_hidden: int):
    """concat-input MLP kernel, feature-major activations (features, TILE_B).

    Ref order: x, W1, b1, (Wi, bi)*, Whead_col, bhead, out.
      x      : (in_dim, TILE_B)  bf16
      Wi     : (Hi, Hi-1)        bf16   (PyTorch (out, in) layout)
      bi     : (Hi, 1)           f32
      Whead  : (H_last, 1)       f32
      bhead  : (1, 1)            f32
      out    : (1, TILE_B)       f32
    """

    def kernel(*refs):
        x_ref = refs[0]
        o_ref = refs[-1]
        w = refs[1:-1]

        # Layer 1 (concat already fused in the wrapper layout transform):
        # (H1, in_dim) @ (in_dim, TILE_B) -> (H1, TILE_B), f32 accumulation.
        h = jnp.dot(w[0][...], x_ref[...], preferred_element_type=jnp.float32)
        h = jnp.maximum(h + w[1][...], 0.0)

        # Remaining hidden layers.
        k = 2
        for _ in range(num_hidden - 1):
            h = jnp.dot(w[k][...], h.astype(jnp.bfloat16),
                        preferred_element_type=jnp.float32)
            h = jnp.maximum(h + w[k + 1][...], 0.0)
            k += 2

        # Head (output_dim == 1): f32 weighted sum over the feature axis on
        # the VPU/XLU -> lane-dense (1, TILE_B) block.
        out = jnp.sum(h * w[k][...], axis=0, keepdims=True) + w[k + 1][...]
        o_ref[...] = out.astype(o_ref.dtype)

    return kernel


def continuous_action_value_function(states, actions, params, *, tile_b=16384):
    """Equivalent of ContinuousActionValueFunction.forward.

    states : (batch, state_dim) float32
    actions: (batch, action_dim) float32
    params : flat tuple (W1, b1, ..., Whead, bhead) in PyTorch nn.Linear layout
             (W is (out_features, in_features), b is (out_features,)); the head
             must have out_features == 1.
    returns: (batch,) float32
    """
    states = jnp.asarray(states, jnp.float32)
    actions = jnp.asarray(actions, jnp.float32)
    batch, state_dim = states.shape
    action_dim = actions.shape[1]
    in_dim = state_dim + action_dim

    if len(params) < 4 or len(params) % 2 != 0:
        raise ValueError("params must be (W, b) pairs: >=1 hidden layer + head")
    num_layers = len(params) // 2
    num_hidden = num_layers - 1
    weights = [jnp.asarray(params[2 * i], jnp.float32) for i in range(num_layers)]
    biases = [jnp.asarray(params[2 * i + 1], jnp.float32) for i in range(num_layers)]
    if weights[-1].shape[0] != 1:
        raise ValueError("head layer must have output_dim == 1")
    if weights[0].shape[1] != in_dim:
        raise ValueError("first layer expects state_dim + action_dim inputs")

    # ---- batch tiling ---------------------------------------------------------
    tile = _choose_tile_b(batch, tile_b)
    num_tiles = pl.cdiv(batch, tile)
    padded = num_tiles * tile

    # ---- torch.cat + feature-major layout + bf16 cast: one HBM pass ----------
    x = jnp.concatenate([states, actions], axis=-1)          # (batch, in_dim)
    if padded != batch:
        x = jnp.pad(x, ((0, padded - batch), (0, 0)))
    x = x.T.astype(jnp.bfloat16)                              # (in_dim, padded)

    # ---- trace-time weight prep (tiny arrays; effectively free) ---------------
    kernel_consts = []
    for li in range(num_hidden):
        kernel_consts += [weights[li].astype(jnp.bfloat16),   # (Hi, Hi-1) bf16
                          biases[li].reshape(-1, 1)]          # (Hi, 1)    f32
    kernel_consts += [weights[-1].reshape(-1, 1),              # (H_last, 1) f32
                      biases[-1].reshape(1, 1)]                # (1, 1)      f32

    # Activation spec: feature-major block, triple-buffered when the grid is
    # long enough for the extra buffer to matter.
    if num_tiles >= 3:
        x_spec = pl.BlockSpec((in_dim, tile), lambda i: (0, i),
                              pipeline_mode=pl.Buffered(3))
    else:
        x_spec = pl.BlockSpec((in_dim, tile), lambda i: (0, i))

    def const_spec(arr):
        return pl.BlockSpec(arr.shape, lambda i: (0, 0))       # VMEM-resident

    out = pl.pallas_call(
        _make_mlp_kernel(num_hidden),
        out_shape=jax.ShapeDtypeStruct((1, padded), jnp.float32),
        grid=(num_tiles,),
        in_specs=[x_spec] + [const_spec(c) for c in kernel_consts],
        out_specs=pl.BlockSpec((1, tile), lambda i: (0, i)),
        compiler_params=pltpu.CompilerParams(
            dimension_semantics=("parallel",)),
    )(x, *kernel_consts)

    # (1, padded) -> (batch,)   [the torch module's squeeze(-1)]
    return out.reshape(-1)[:batch]


def init_params(key, state_dim, action_dim, mlp_widths):
    """PyTorch nn.Linear-style init: W (out, in), b (out,), uniform ±1/sqrt(fan_in)."""
    dims = [state_dim + action_dim] + list(mlp_widths) + [1]
    params = []
    for fan_in, fan_out in zip(dims[:-1], dims[1:]):
        key, kw, kb = jax.random.split(key, 3)
        bound = 1.0 / float(fan_in) ** 0.5
        w = jax.random.uniform(kw, (fan_out, fan_in), jnp.float32, -bound, bound)
        b = jax.random.uniform(kb, (fan_out,), jnp.float32, -bound, bound)
        params.extend([w, b])
    return tuple(params)


def reference_mlp(states, actions, params):
    """Pure-JAX f32 reference for correctness checking."""
    x = jnp.concatenate([states, actions], axis=-1)
    n = len(params) // 2
    h = x
    for i in range(n - 1):
        w, b = params[2 * i], params[2 * i + 1]
        h = jnp.maximum(jnp.dot(h, w.T) + b, 0.0)
    w_head, b_head = params[-2], params[-1]
    return jnp.sum(h * w_head[0], axis=-1) + b_head[0]


if __name__ == "__main__":
    # Shapes consistent with the module: state_dim=12, action_dim=4, widths=[32, 32].
    state_dim, action_dim, mlp_widths = 12, 4, [32, 32]
    key = jax.random.PRNGKey(0)
    k_params, k_s1, k_a1, k_s2, k_a2, k_s3, k_a3 = jax.random.split(key, 7)
    params = init_params(k_params, state_dim, action_dim, mlp_widths)

    value_fn = jax.jit(continuous_action_value_function,
                       static_argnames=("tile_b",))

    # bf16 MXU operands (same rounding as default-precision f32 dots) -> ~1e-3
    # agreement with the pure-f32 reference; real bugs are orders larger.
    TOL = dict(atol=2e-3, rtol=2e-3)

    # 1) Small batch: single 128-wide tile, padded rows sliced away.
    batch = 8
    states = jax.random.normal(k_s1, (batch, state_dim), jnp.float32)
    actions = jax.random.normal(k_a1, (batch, action_dim), jnp.float32)
    vals = jax.block_until_ready(value_fn(states, actions, params))
    ref = reference_mlp(states, actions, params)
    assert vals.shape == (batch,)
    assert jnp.allclose(vals, ref, **TOL)

    # 2) Unaligned mid-size batch: 2 tiles + padding (pipelined path).
    batch2 = 200
    states2 = jax.random.normal(k_s2, (batch2, state_dim), jnp.float32)
    actions2 = jax.random.normal(k_a2, (batch2, action_dim), jnp.float32)
    vals2 = jax.block_until_ready(value_fn(states2, actions2, params))
    ref2 = reference_mlp(states2, actions2, params)
    assert vals2.shape == (batch2,)
    assert jnp.allclose(vals2, ref2, **TOL)

    # 3) Larger batch: 4 tiles -> triple-buffered input + megacore-friendly grid.
    batch3 = 2048
    states3 = jax.random.normal(k_s3, (batch3, state_dim), jnp.float32)
    actions3 = jax.random.normal(k_a3, (batch3, action_dim), jnp.float32)
    vals3 = jax.block_until_ready(value_fn(states3, actions3, params))
    ref3 = reference_mlp(states3, actions3, params)
    assert vals3.shape == (batch3,)
    assert jnp.allclose(vals3, ref3, **TOL)

    print("KERNEL_OK")
</pallas_src>

<mosaic_0001>
module attributes {stable_mosaic.version = 11 : i64} {
  func.func @kernel(%arg0: i32, %arg1: memref<16x128xbf16, #tpu.memory_space<vmem>>, %arg2: memref<32x16xbf16, #tpu.memory_space<vmem>>, %arg3: memref<32x1xf32, #tpu.memory_space<vmem>>, %arg4: memref<32x32xbf16, #tpu.memory_space<vmem>>, %arg5: memref<32x1xf32, #tpu.memory_space<vmem>>, %arg6: memref<32x1xf32, #tpu.memory_space<vmem>>, %arg7: memref<1x1xf32, #tpu.memory_space<vmem>>, %arg8: memref<1x128xf32, #tpu.memory_space<vmem>>) attributes {dimension_semantics = [#tpu.dimension_semantics<parallel>], iteration_bounds = array<i64: 1>, scalar_prefetch = 0 : i64, scratch_operands = 0 : i64, tpu.core_type = #tpu.core_type<tc>, window_params = [{transform_indices = @transform_0, window_bounds = array<i64: 16, 128>}, {pipeline_mode = #tpu.pipeline_mode<synchronous>, transform_indices = @transform_1, window_bounds = array<i64: 32, 16>}, {pipeline_mode = #tpu.pipeline_mode<synchronous>, transform_indices = @transform_2, window_bounds = array<i64: 32, 1>}, {pipeline_mode = #tpu.pipeline_mode<synchronous>, transform_indices = @transform_3, window_bounds = array<i64: 32, 32>}, {pipeline_mode = #tpu.pipeline_mode<synchronous>, transform_indices = @transform_4, window_bounds = array<i64: 32, 1>}, {pipeline_mode = #tpu.pipeline_mode<synchronous>, transform_indices = @transform_5, window_bounds = array<i64: 32, 1>}, {pipeline_mode = #tpu.pipeline_mode<synchronous>, transform_indices = @transform_6, window_bounds = array<i64: 1, 1>}, {transform_indices = @transform_7, window_bounds = array<i64: 1, 128>}]} {
    %c0 = arith.constant 0 : index
    %c0_0 = arith.constant 0 : index
    %0 = vector.load %arg2[%c0, %c0_0] : memref<32x16xbf16, #tpu.memory_space<vmem>>, vector<32x16xbf16>
    %c0_1 = arith.constant 0 : index
    %c0_2 = arith.constant 0 : index
    %1 = vector.load %arg1[%c0_1, %c0_2] : memref<16x128xbf16, #tpu.memory_space<vmem>>, vector<16x128xbf16>
    %cst = arith.constant dense<0.000000e+00> : vector<32x128xf32>
    %2 = tpu.matmul %0, %1, %cst {dimension_numbers = #tpu.dot_dimension_numbers<[1], [0], [0], [1], [0, 0, 1, 1], [], []>} : vector<32x16xbf16>, vector<16x128xbf16>, vector<32x128xf32> -> vector<32x128xf32>
    %c0_3 = arith.constant 0 : index
    %c0_4 = arith.constant 0 : index
    %3 = vector.load %arg3[%c0_3, %c0_4] : memref<32x1xf32, #tpu.memory_space<vmem>>, vector<32x1xf32>
    %4 = vector.broadcast %3 : vector<32x1xf32> to vector<32x128xf32>
    %5 = arith.addf %2, %4 : vector<32x128xf32>
    %cst_5 = arith.constant 0.000000e+00 : f32
    %6 = vector.broadcast %cst_5 : f32 to vector<32x128xf32>
    %7 = arith.maximumf %5, %6 : vector<32x128xf32>
    %c0_6 = arith.constant 0 : index
    %c0_7 = arith.constant 0 : index
    %8 = vector.load %arg4[%c0_6, %c0_7] : memref<32x32xbf16, #tpu.memory_space<vmem>>, vector<32x32xbf16>
    %9 = arith.truncf %7 : vector<32x128xf32> to vector<32x128xbf16>
    %cst_8 = arith.constant dense<0.000000e+00> : vector<32x128xf32>
    %10 = tpu.matmul %8, %9, %cst_8 {dimension_numbers = #tpu.dot_dimension_numbers<[1], [0], [0], [1], [0, 0, 1, 1], [], []>} : vector<32x32xbf16>, vector<32x128xbf16>, vector<32x128xf32> -> vector<32x128xf32>
    %c0_9 = arith.constant 0 : index
    %c0_10 = arith.constant 0 : index
    %11 = vector.load %arg5[%c0_9, %c0_10] : memref<32x1xf32, #tpu.memory_space<vmem>>, vector<32x1xf32>
    %12 = vector.broadcast %11 : vector<32x1xf32> to vector<32x128xf32>
    %13 = arith.addf %10, %12 : vector<32x128xf32>
    %cst_11 = arith.constant 0.000000e+00 : f32
    %14 = vector.broadcast %cst_11 : f32 to vector<32x128xf32>
    %15 = arith.maximumf %13, %14 : vector<32x128xf32>
    %c0_12 = arith.constant 0 : index
    %c0_13 = arith.constant 0 : index
    %16 = vector.load %arg6[%c0_12, %c0_13] : memref<32x1xf32, #tpu.memory_space<vmem>>, vector<32x1xf32>
    %17 = vector.broadcast %16 : vector<32x1xf32> to vector<32x128xf32>
    %18 = arith.mulf %15, %17 : vector<32x128xf32>
    %cst_14 = arith.constant dense<0.000000e+00> : vector<128xf32>
    %19 = vector.multi_reduction <add>, %18, %cst_14 [0] : vector<32x128xf32> to vector<128xf32>
    %20 = vector.shape_cast %19 : vector<128xf32> to vector<1x128xf32>
    %c0_15 = arith.constant 0 : index
    %c0_16 = arith.constant 0 : index
    %21 = vector.load %arg7[%c0_15, %c0_16] : memref<1x1xf32, #tpu.memory_space<vmem>>, vector<1x1xf32>
    %22 = vector.broadcast %21 : vector<1x1xf32> to vector<1x128xf32>
    %23 = arith.addf %20, %22 : vector<1x128xf32>
    %c0_17 = arith.constant 0 : index
    %c0_18 = arith.constant 0 : index
    %24 = vector.load %arg8[%c0_17, %c0_18] : memref<1x128xf32, #tpu.memory_space<vmem>>, vector<1x128xf32>
    tpu.vector_store %arg8[%c0_17, %c0_18], %23 {strides = array<i32>} : memref<1x128xf32, #tpu.memory_space<vmem>>, vector<1x128xf32>,
    return
  }
  func.func @transform_0(%arg0: i32) -> (i32, i32) {
    %c0_i32 = arith.constant 0 : i32
    %c0_i32_0 = arith.constant 0 : i32
    return %c0_i32, %arg0 : i32, i32
  }
  func.func @transform_1(%arg0: i32) -> (i32, i32) {
    %c0_i32 = arith.constant 0 : i32
    %c0_i32_0 = arith.constant 0 : i32
    %c0_i32_1 = arith.constant 0 : i32
    return %c0_i32, %c0_i32_0 : i32, i32
  }
  func.func @transform_2(%arg0: i32) -> (i32, i32) {
    %c0_i32 = arith.constant 0 : i32
    %c0_i32_0 = arith.constant 0 : i32
    %c0_i32_1 = arith.constant 0 : i32
    return %c0_i32, %c0_i32_0 : i32, i32
  }
  func.func @transform_3(%arg0: i32) -> (i32, i32) {
    %c0_i32 = arith.constant 0 : i32
    %c0_i32_0 = arith.constant 0 : i32
    %c0_i32_1 = arith.constant 0 : i32
    return %c0_i32, %c0_i32_0 : i32, i32
  }
  func.func @transform_4(%arg0: i32) -> (i32, i32) {
    %c0_i32 = arith.constant 0 : i32
    %c0_i32_0 = arith.constant 0 : i32
    %c0_i32_1 = arith.constant 0 : i32
    return %c0_i32, %c0_i32_0 : i32, i32
  }
  func.func @transform_5(%arg0: i32) -> (i32, i32) {
    %c0_i32 = arith.constant 0 : i32
    %c0_i32_0 = arith.constant 0 : i32
    %c0_i32_1 = arith.constant 0 : i32
    return %c0_i32, %c0_i32_0 : i32, i32
  }
  func.func @transform_6(%arg0: i32) -> (i32, i32) {
    %c0_i32 = arith.constant 0 : i32
    %c0_i32_0 = arith.constant 0 : i32
    %c0_i32_1 = arith.constant 0 : i32
    return %c0_i32, %c0_i32_0 : i32, i32
  }
  func.func @transform_7(%arg0: i32) -> (i32, i32) {
    %c0_i32 = arith.constant 0 : i32
    %c0_i32_0 = arith.constant 0 : i32
    return %c0_i32, %arg0 : i32, i32
  }
}

</mosaic_0001>

<bundles_post_ra>
// kernel: continuous_action_value_function.1
= control target key start
LH: loop header
LB: loop body
LE: loop exit
PB: predicated region body
PF: predicated region fallthrough
CT: control target
= control target key end

     0   :  { %vm75_vm0 = vcmask 130048   ;;  %v326_v1 = vmov 0   ;;  %vm175_vm1 = vcmask 261120   ;;  %s428_s0 = inlined_call_operand.vmem [shape: bf16[16,128], index: 0, kind: input, shape index: {}]   ;;  %s429_s1 = inlined_call_operand.vmem [shape: bf16[32,16], index: 1, kind: input, shape index: {}]   ;;  %s430_s6 = inlined_call_operand.<no memory space> [shape: f32[1,1], index: 6, kind: input, shape index: {}]   ;;  %s431_s2 = inlined_call_operand.vmem [shape: f32[32,1], index: 2, kind: input, shape index: {}]   ;;  %s432_s4 = inlined_call_operand.vmem [shape: f32[32,1], index: 4, kind: input, shape index: {}]   ;;  %s433_s5 = inlined_call_operand.vmem [shape: f32[32,1], index: 5, kind: input, shape index: {}]   ;;  %s434_s3 = inlined_call_operand.vmem [shape: bf16[32,32], index: 3, kind: input, shape index: {}]   ;;  %s435_s7 = inlined_call_operand.vmem [shape: f32[1,128], index: 7, kind: output, shape index: {}]  }
   0x1   :  { %v321_v0 = vld [vmem:[%s428_s0] sm:$0xff]   ;;  %319 = vset.pattern.permute.xlu0 %v326_v1  ;;  %320 = vset.pattern.permute.xlu1 %v326_v1  ;;  %v12_v2 = vstv %s430_s6  ;;  %v323_v4 = vld [vmem:[%s429_s1 + $0x8] sm:$0xff]   ;;  %v37_v5 = vld [vmem:[%s431_s2 + $0x10] sm:$0xff] }
   0x2   :  { %v322_v3 = vld [vmem:[%s429_s1] sm:$0xff]   ;;  %13 = vst [vmem:[#allocation2] sm:$0x1] %v12_v2  ;;  %304 = vmatprep.subr.bf16.mxu0 %v321_v0  ;;  %51 = vperm.xlu0 %319, %v37_v5   ;;  %v38_v7 = vld [vmem:[%s431_s2 + $0x18] sm:$0xff]  ;;  %v36_v8 = vld [vmem:[%s431_s2 + $0x8] sm:$0xff] }
   0x3   :  { %305 = vmatpush3.bf16.msra.mxu0 %v321_v0  ;;  %306 = vmatprep.mubr.msk.bf16.mxu0 %vm75_vm0, %v322_v3  ;;  %v35_v6 = vld [vmem:[%s431_s2] sm:$0xff]  ;;  %v142_v10 = vld [vmem:[%s432_s4 + $0x8] sm:$0xff]  ;;  %v143_v11 = vld [vmem:[%s432_s4 + $0x10] sm:$0xff]  ;;  %v278_v0 = vlaneseq }
   0x4   :  { %41 = vperm.xlu1 %320, %v35_v6   ;;  %v141_v9 = vld [vmem:[%s432_s4] sm:$0xff]  ;;  %v144_v12 = vld [vmem:[%s432_s4 + $0x18] sm:$0xff]  ;;  %v236_v14 = vld [vmem:[%s433_s5 + $0x8] sm:$0xff] }
   0x5   :  { %v235_v13 = vld [vmem:[%s433_s5] sm:$0xff]  ;;  %v237_v15 = vld [vmem:[%s433_s5 + $0x10] sm:$0xff]  ;;  %v238_v16 = vld [vmem:[%s433_s5 + $0x18] sm:$0xff]  ;;  %v279_v3 = vshrl.u32 %v278_v0, 7 }
   0x6   :  { %307 = vmatmul.mubr.msk.bf16.vlgmr.msra.gmra.mxu0 %vm75_vm0, %v323_v4  ;;  %56 = vperm.xlu0 %319, %v38_v7   ;;  %v324_v18 = vld [vmem:[%s434_s3] sm:$0xff]   ;;  %v325_v37 = vld [vmem:[%s434_s3 + $0x8] sm:$0xff]  }
   0x7   :  { %314 = vmatprep.mubr.msk.bf16.mxu1 %vm175_vm1, %v324_v18  ;;  %v280_v6 = vsub.s32 0, %v279_v3 }
   0x8   :  { %46 = vperm.xlu1 %320, %v36_v8  }
   0x9   :  { %v272_v17 = vld [vmem:[#allocation2] sm:$0x1] }
   0xa   :  { %147 = vperm.xlu0 %319, %v141_v9  }
   0xc   :  { %152 = vperm.xlu1 %320, %v142_v10  }
   0xe   :  { %157 = vperm.xlu0 %319, %v143_v11  }
  0x10   :  { %162 = vperm.xlu1 %320, %v144_v12  }
  0x12   :  { %241 = vperm.xlu0 %319, %v235_v13  }
  0x14   :  { %246 = vperm.xlu1 %320, %v236_v14  }
  0x16   :  { %251 = vperm.xlu0 %319, %v237_v15  }
  0x18   :  { %256 = vperm.xlu1 %320, %v238_v16  }
  0x1a   :  { %275 = vperm.xlu0 %319, %v272_v17  }
  0x7d   :  { %v52_v19 = vpop.permute.xlu0 %51 }
  0x7f   :  { %v42_v20 = vpop.permute.xlu1 %41 }
  0x81   :  { %v57_v24 = vpop.permute.xlu0 %56 }
  0x83   :  { %v47_v28 = vpop.permute.xlu1 %46 }
  0x85   :  { %v148_v38 = vpop.permute.xlu0 %147 }
  0x87   :  { %v153_v39 = vpop.permute.xlu1 %152 }
  0x89   :  { %v158_v40 = vpop.permute.xlu0 %157 }
  0x8b   :  { %v163_v42 = vpop.permute.xlu1 %162 }
  0x8d   :  { %v242_v47 = vpop.permute.xlu0 %241 }
  0x8f   :  { %v247_v52 = vpop.permute.xlu1 %246 }
  0x91   :  { %v252_v58 = vpop.permute.xlu0 %251 }
  0x93   :  { %v257_v61 = vpop.permute.xlu1 %256 }
  0x95   :  { %v276_v8 = vpop.permute.xlu0 %275 }
  0x96   :  { %v281_v10 = vrot.slane %v276_v8, %v280_v6 }
  0xc6   :  { %v308_v21 = vpop.f32.mrf.mxu0 }
  0xc7   :  { %v125_v23 = vadd.f32 %v308_v21, %v52_v19 }
  0xc8   :  { %v116_v22 = vpop.f32.mrf.mxu0 }
  0xc9   :  { %v117_v26 = vadd.f32 %v116_v22, %v42_v20  ;;  %v133_v30 = vmax.f32 %v125_v23, 0.0 }
  0xca   :  { %v309_v25 = vpop.f32.mrf.mxu0 }
  0xcb   :  { %v128_v27 = vadd.f32 %v309_v25, %v57_v24  ;;  %v131_v33 = vmax.f32 %v117_v26, 0.0 }
  0xcc   :  { %v119_v29 = vpop.f32.mrf.mxu0 }
  0xcd   :  { %v134_v31 = vmax.f32 %v128_v27, 0.0  ;;  %v120_v32 = vadd.f32 %v119_v29, %v47_v28 }
  0xcf   :  { %v132_v34 = vmax.f32 %v120_v32, 0.0  ;;  %v140_v35 = vpack.c.bf16 %v134_v31, %v133_v30 }
  0xd1   :  { %v139_v36 = vpack.c.bf16 %v132_v34, %v131_v33  ;;  %310 = vmatprep.subr.bf16.mxu1 %v140_v35 }
  0xd2   :  { %311 = vmatpush3.bf16.msra.mxu1 %v140_v35 }
  0xd3   :  { %312 = vmatprep.subr.bf16.mxu1 %v139_v36 }
  0xd6   :  { %313 = vmatpush3.bf16.msra.mxu1 %v139_v36 }
  0xd9   :  { %315 = vmatmul.mubr.msk.bf16.vlgmr.msra.gmra.mxu1 %vm175_vm1, %v325_v37 }
 0x199   :  { %v316_v41 = vpop.f32.mrf.mxu1 }
 0x19a   :  { %v225_v46 = vadd.f32 %v316_v41, %v158_v40 }
 0x19b   :  { %v216_v43 = vpop.f32.mrf.mxu1 }
 0x19c   :  { %v217_v44 = vadd.f32 %v216_v43, %v148_v38  ;;  %v233_v53 = vmax.f32 %v225_v46, 0.0 }
 0x19d   :  { %v317_v45 = vpop.f32.mrf.mxu1 }
 0x19e   :  { %v231_v49 = vmax.f32 %v217_v44, 0.0  ;;  %v228_v50 = vadd.f32 %v317_v45, %v163_v42  ;;  %v261_v59 = vmul.f32 %v252_v58, %v233_v53 }
 0x19f   :  { %v219_v48 = vpop.f32.mrf.mxu1 }
 0x1a0   :  { %v220_v51 = vadd.f32 %v219_v48, %v153_v39  ;;  %v259_v55 = vmul.f32 %v242_v47, %v231_v49  ;;  %v234_v56 = vmax.f32 %v228_v50, 0.0 }
 0x1a2   :  { %v232_v54 = vmax.f32 %v220_v51, 0.0  ;;  %v262_v62 = vmul.f32 %v257_v61, %v234_v56 }
 0x1a4   :  { %v260_v57 = vmul.f32 %v247_v52, %v232_v54 }
 0x1a6   :  { %v263_v60 = vadd.f32 %v260_v57, %v259_v55 }
 0x1a8   :  { %v264_v63 = vadd.f32 %v263_v60, %v261_v59 }
 0x1aa   :  { %v265_v1 = vadd.f32 %v264_v63, %v262_v62 }
 0x1ac   :  { %v266_v2 = vrot.slane %v265_v1, 4 }
 0x1ae   :  { %v267_v4 = vadd.f32 %v266_v2, %v265_v1 }
 0x1b0   :  { %v268_v5 = vrot.slane %v267_v4, 2 }
 0x1b2   :  { %v269_v7 = vadd.f32 %v268_v5, %v267_v4 }
 0x1b4   :  { %v270_v9 = vrot.slane %v269_v7, 1 }
 0x1b6   :  { %v271_v11 = vadd.f32 %v270_v9, %v269_v7 }
 0x1b8   :  { %v282_v12 = vadd.f32 %v281_v10, %v271_v11 }
 0x1ba   :  { %283 = vst [vmem:[%s435_s7] sm:$0x1] %v282_v12 }

</bundles_post_ra>
